<compile_context>
chip_gen: v7x
topology: tpu7x:2x2x1
jax: 0.10.0
libtpu: 0.0.40
codegen_flags: <defaults>
</compile_context>

<pallas_src>
import functools

import jax
import jax.numpy as jnp
from jax.experimental import pallas as pl
from jax.experimental.pallas import tpu as pltpu


def _log_sigmoid(x):
    # Numerically stable: log(sigmoid(x)) = min(x, 0) - log(1 + exp(-|x|)).
    # Since exp(-|x|) <= 1, the absolute error of log(1+t) vs log1p(t) is ~1 ulp,
    # which is negligible for this averaged loss.
    return jnp.minimum(x, 0.0) - jnp.log(1.0 + jnp.exp(-jnp.abs(x)))


def _triplet_loss_kernel(ivec_ref, vec_ref, out_ref, acc_ref, *, n_ctx, n_inner):
    """One batch tile: accumulate the sum of log-sigmoid scores.

    ivec_ref: (tile_b, D)     center vectors
    vec_ref : (tile_b, K, D)  [context | negative] vectors, K = C*(1+n_neg)
    out_ref : (8, 128)        lane-dense partial-sum slab for this outer index
    acc_ref : (1, 1) f32      running sum across the inner (arbitrary) axis
    """
    j = pl.program_id(1)

    @pl.when(j == 0)
    def _init():
        acc_ref[...] = jnp.zeros_like(acc_ref)

    ivec = ivec_ref[...].astype(jnp.float32)            # (tb, D)
    vec = vec_ref[...].astype(jnp.float32)              # (tb, K, D)

    # Per-(row, k) dot product over D (VPU multiply + XLU lane reduce).
    scores = jnp.sum(vec * ivec[:, None, :], axis=-1)   # (tb, K)

    # First n_ctx columns are positive contexts; remaining columns are negatives
    # whose score enters log-sigmoid with a flipped sign (nvectors.neg()).
    col = jax.lax.broadcasted_iota(jnp.int32, scores.shape, dimension=1)
    signed = jnp.where(col < n_ctx, scores, -scores)

    total = jnp.sum(_log_sigmoid(signed))                # rank-0 f32
    acc_ref[...] = acc_ref[...] + jnp.broadcast_to(total, (1, 1))

    @pl.when(j == n_inner - 1)
    def _finalize():
        out_ref[...] = jnp.broadcast_to(acc_ref[...], out_ref.shape).astype(jnp.float32)


def _choose_tiling(batch, tile_b):
    """Pick (n_outer, tile_b, n_inner) with TPU-friendly (multiple-of-8) tiles."""
    n_outer = 2 if batch % 16 == 0 else 1   # two-way core split only if each half tiles cleanly
    per_core = batch // n_outer
    if per_core % 8 == 0:
        t = max(8, (min(tile_b, per_core) // 8) * 8)
        while per_core % t != 0:
            t -= 8
        tile_b = t
    else:
        tile_b = per_core                    # full-extent batch block (always legal)
    return n_outer, tile_b, per_core // tile_b


def node2vec_triplet_loss(in_embed, out_embed, iwords, owords, nwords, n_neg, *, tile_b=256):
    """Pallas implementation of Node2VecTripletLoss.forward.

    in_embed:  (V, D) input-embedding table  (model.forward_i)
    out_embed: (V, D) output-embedding table (model.forward_o)
    iwords:    (B,)           int32
    owords:    (B, C)         int32
    nwords:    (B, C * n_neg) int32
    """
    B = iwords.shape[0]
    C = owords.shape[1]
    D = in_embed.shape[1]
    K = C * (1 + n_neg)
    assert nwords.shape == (B, C * n_neg), (nwords.shape, (B, C * n_neg))

    n_outer, tile_b, n_inner = _choose_tiling(B, tile_b)

    # Embedding gathers (glue, plain JAX).  One concatenated index stream gives
    # a single gathered tensor -> a single DMA stream into the kernel.
    # TODO(synk): fuse these gathers into the kernel (scalar-prefetch index
    # arrays + manual DMA from the embedding tables) to avoid writing `vec` to
    # HBM and re-reading it.
    words = jnp.concatenate([owords, nwords], axis=1)    # (B, K)
    ivec = in_embed[iwords]                              # (B, D)
    vec = out_embed[words]                               # (B, K, D)

    kernel = functools.partial(_triplet_loss_kernel, n_ctx=C, n_inner=n_inner)

    partial_slabs = pl.pallas_call(
        kernel,
        out_shape=jax.ShapeDtypeStruct((n_outer * 8, 128), jnp.float32),
        grid_spec=pltpu.PrefetchScalarGridSpec(
            num_scalar_prefetch=0,
            grid=(n_outer, n_inner),
            in_specs=[
                pl.BlockSpec((tile_b, D), lambda i, j: (i * n_inner + j, 0)),
                pl.BlockSpec((tile_b, K, D), lambda i, j: (i * n_inner + j, 0, 0)),
            ],
            out_specs=pl.BlockSpec((8, 128), lambda i, j: (i, 0)),
            scratch_shapes=[pltpu.VMEM((1, 1), jnp.float32)],
        ),
        compiler_params=pltpu.CompilerParams(
            dimension_semantics=("parallel", "arbitrary"),
            vmem_limit_bytes=32 * 1024 * 1024,
        ),
    )(ivec, vec)

    partials = partial_slabs.reshape(n_outer, 8, 128)[:, 0, 0]   # (n_outer,)
    return -jnp.sum(partials) / jnp.float32(B * C)


def reference_loss(in_embed, out_embed, iwords, owords, nwords, n_neg):
    """Pure-JAX mirror of the PyTorch forward, for verification."""
    ivec = in_embed[iwords].astype(jnp.float32)                   # (B, D)
    ovec = out_embed[owords].astype(jnp.float32)                  # (B, C, D)
    nvec = -out_embed[nwords].astype(jnp.float32)                 # (B, C*n_neg, D)
    o_sc = jnp.sum(ovec * ivec[:, None, :], axis=-1)              # (B, C)
    n_sc = jnp.sum(nvec * ivec[:, None, :], axis=-1)              # (B, C*n_neg)
    oloss = jax.nn.log_sigmoid(o_sc).mean(axis=1)
    B, C = owords.shape
    nloss = jax.nn.log_sigmoid(n_sc).reshape(B, C, n_neg).sum(axis=2).mean(axis=1)
    return -(oloss + nloss).mean()


if __name__ == "__main__":
    # Small, deterministic synthetic setup (lane-dense D=128).
    V, D = 256, 128        # vocab size, embedding dim
    B, C, n_neg = 64, 4, 3  # batch, contexts per center, negatives per context

    key = jax.random.PRNGKey(0)
    k_in, k_out, k_iw, k_ow, k_nw = jax.random.split(key, 5)

    in_embed = jax.random.normal(k_in, (V, D), dtype=jnp.float32) * 0.1
    out_embed = jax.random.normal(k_out, (V, D), dtype=jnp.float32) * 0.1

    iwords = jax.random.randint(k_iw, (B,), 0, V, dtype=jnp.int32)
    owords = jax.random.randint(k_ow, (B, C), 0, V, dtype=jnp.int32)
    nwords = jax.random.randint(k_nw, (B, C * n_neg), 0, V, dtype=jnp.int32)

    # tile_b=8 with B=64 exercises the full 2x4 (parallel x arbitrary) grid and
    # the pl.when init/accumulate/finalize path.
    loss = node2vec_triplet_loss(
        in_embed, out_embed, iwords, owords, nwords, n_neg, tile_b=8
    )
    loss = jax.block_until_ready(loss)

    ref = reference_loss(in_embed, out_embed, iwords, owords, nwords, n_neg)
    assert jnp.allclose(loss, ref, atol=1e-5, rtol=1e-5), (loss, ref)

    print("KERNEL_OK")
</pallas_src>

<mosaic_0001>
module attributes {stable_mosaic.version = 11 : i64} {
  func.func @_triplet_loss_kernel(%arg0: i32, %arg1: i32, %arg2: memref<8x128xf32, #tpu.memory_space<vmem>>, %arg3: memref<8x16x128xf32, #tpu.memory_space<vmem>>, %arg4: memref<8x128xf32, #tpu.memory_space<vmem>>, %arg5: memref<1x1xf32, #tpu.memory_space<vmem>>) attributes {dimension_semantics = [#tpu.dimension_semantics<parallel>, #tpu.dimension_semantics<arbitrary>], iteration_bounds = array<i64: 2, 4>, scalar_prefetch = 0 : i64, scratch_operands = 1 : i64, tpu.core_type = #tpu.core_type<tc>, window_params = [{transform_indices = @transform_0, window_bounds = array<i64: 8, 128>}, {transform_indices = @transform_1, window_bounds = array<i64: 8, 16, 128>}, {transform_indices = @transform_2, window_bounds = array<i64: 8, 128>}]} {
    %c0_i32 = arith.constant 0 : i32
    %0 = arith.cmpi eq, %arg1, %c0_i32 : i32
    %1 = arith.extui %0 : i1 to i32
    %c0_i32_0 = arith.constant 0 : i32
    %2 = arith.cmpi ne, %1, %c0_i32_0 : i32
    scf.if %2 {
      %cst_15 = arith.constant 0.000000e+00 : f32
      %36 = vector.broadcast %cst_15 : f32 to vector<1x1xf32>
      %c0_16 = arith.constant 0 : index
      %c0_17 = arith.constant 0 : index
      %37 = vector.load %arg5[%c0_16, %c0_17] : memref<1x1xf32, #tpu.memory_space<vmem>>, vector<1x1xf32>
      tpu.vector_store %arg5[%c0_16, %c0_17], %36 {strides = array<i32>} : memref<1x1xf32, #tpu.memory_space<vmem>>, vector<1x1xf32>,
    } else {
    }
    %c0 = arith.constant 0 : index
    %c0_1 = arith.constant 0 : index
    %3 = vector.load %arg2[%c0, %c0_1] : memref<8x128xf32, #tpu.memory_space<vmem>>, vector<8x128xf32>
    %c0_2 = arith.constant 0 : index
    %c0_3 = arith.constant 0 : index
    %c0_4 = arith.constant 0 : index
    %4 = vector.load %arg3[%c0_2, %c0_3, %c0_4] : memref<8x16x128xf32, #tpu.memory_space<vmem>>, vector<8x16x128xf32>
    %5 = vector.shape_cast %3 : vector<8x128xf32> to vector<8x1x128xf32>
    %6 = vector.broadcast %5 : vector<8x1x128xf32> to vector<8x16x128xf32>
    %7 = arith.mulf %4, %6 : vector<8x16x128xf32>
    %cst = arith.constant dense<0.000000e+00> : vector<8x16xf32>
    %8 = vector.multi_reduction <add>, %7, %cst [2] : vector<8x16x128xf32> to vector<8x16xf32>
    %9 = tpu.iota {dimensions = array<i32: 1>} : vector<8x16xi32>
    %c4_i32 = arith.constant 4 : i32
    %10 = vector.broadcast %c4_i32 : i32 to vector<8x16xi32>
    %11 = arith.cmpi slt, %9, %10 : vector<8x16xi32>
    %cst_5 = arith.constant 0.000000e+00 : f32
    %12 = vector.broadcast %cst_5 : f32 to vector<8x16xf32>
    %13 = arith.subf %12, %8 : vector<8x16xf32>
    %14 = arith.select %11, %8, %13 : vector<8x16xi1>, vector<8x16xf32>
    %cst_6 = arith.constant 0.000000e+00 : f32
    %15 = vector.broadcast %cst_6 : f32 to vector<8x16xf32>
    %16 = arith.minimumf %14, %15 : vector<8x16xf32>
    %17 = math.absf %14 : vector<8x16xf32>
    %cst_7 = arith.constant 0.000000e+00 : f32
    %18 = vector.broadcast %cst_7 : f32 to vector<8x16xf32>
    %19 = arith.subf %18, %17 : vector<8x16xf32>
    %20 = math.exp %19 : vector<8x16xf32>
    %cst_8 = arith.constant 1.000000e+00 : f32
    %21 = vector.broadcast %cst_8 : f32 to vector<8x16xf32>
    %22 = arith.addf %21, %20 : vector<8x16xf32>
    %23 = math.log %22 : vector<8x16xf32>
    %24 = arith.subf %16, %23 : vector<8x16xf32>
    %25 = vector.shape_cast %24 : vector<8x16xf32> to vector<1x8x16xf32>
    %cst_9 = arith.constant dense<0.000000e+00> : vector<1xf32>
    %26 = vector.multi_reduction <add>, %25, %cst_9 [1, 2] : vector<1x8x16xf32> to vector<1xf32>
    %27 = vector.shape_cast %26 : vector<1xf32> to vector<1x1x1xf32>
    %28 = vector.extract %27[0, 0, 0] : f32 from vector<1x1x1xf32>
    %c0_10 = arith.constant 0 : index
    %c0_11 = arith.constant 0 : index
    %29 = vector.load %arg5[%c0_10, %c0_11] : memref<1x1xf32, #tpu.memory_space<vmem>>, vector<1x1xf32>
    %30 = vector.broadcast %28 : f32 to vector<1x1xf32>
    %31 = arith.addf %29, %30 : vector<1x1xf32>
    %c0_12 = arith.constant 0 : index
    %c0_13 = arith.constant 0 : index
    %32 = vector.load %arg5[%c0_12, %c0_13] : memref<1x1xf32, #tpu.memory_space<vmem>>, vector<1x1xf32>
    tpu.vector_store %arg5[%c0_12, %c0_13], %31 {strides = array<i32>} : memref<1x1xf32, #tpu.memory_space<vmem>>, vector<1x1xf32>,
    %c3_i32 = arith.constant 3 : i32
    %33 = arith.cmpi eq, %arg1, %c3_i32 : i32
    %34 = arith.extui %33 : i1 to i32
    %c0_i32_14 = arith.constant 0 : i32
    %35 = arith.cmpi ne, %34, %c0_i32_14 : i32
    scf.if %35 {
      %c0_15 = arith.constant 0 : index
      %c0_16 = arith.constant 0 : index
      %36 = vector.load %arg5[%c0_15, %c0_16] : memref<1x1xf32, #tpu.memory_space<vmem>>, vector<1x1xf32>
      %37 = vector.shape_cast %36 : vector<1x1xf32> to vector<1x1xf32>
      %38 = vector.broadcast %37 : vector<1x1xf32> to vector<8x128xf32>
      %c0_17 = arith.constant 0 : index
      %c0_18 = arith.constant 0 : index
      %39 = vector.load %arg4[%c0_17, %c0_18] : memref<8x128xf32, #tpu.memory_space<vmem>>, vector<8x128xf32>
      tpu.vector_store %arg4[%c0_17, %c0_18], %38 {strides = array<i32>} : memref<8x128xf32, #tpu.memory_space<vmem>>, vector<8x128xf32>,
    } else {
    }
    return
  }
  func.func @transform_0(%arg0: i32, %arg1: i32) -> (i32, i32) {
    %c4_i32 = arith.constant 4 : i32
    %0 = arith.muli %arg0, %c4_i32 : i32
    %1 = arith.addi %0, %arg1 : i32
    %c0_i32 = arith.constant 0 : i32
    %c0_i32_0 = arith.constant 0 : i32
    return %1, %c0_i32 : i32, i32
  }
  func.func @transform_1(%arg0: i32, %arg1: i32) -> (i32, i32, i32) {
    %c4_i32 = arith.constant 4 : i32
    %0 = arith.muli %arg0, %c4_i32 : i32
    %1 = arith.addi %0, %arg1 : i32
    %c0_i32 = arith.constant 0 : i32
    %c0_i32_0 = arith.constant 0 : i32
    %c0_i32_1 = arith.constant 0 : i32
    return %1, %c0_i32, %c0_i32_0 : i32, i32, i32
  }
  func.func @transform_2(%arg0: i32, %arg1: i32) -> (i32, i32) {
    %c0_i32 = arith.constant 0 : i32
    %c0_i32_0 = arith.constant 0 : i32
    return %arg0, %c0_i32 : i32, i32
  }
}

</mosaic_0001>

<bundles_post_ra>
// kernel: tpu_custom_call.1
= control target key start
LH: loop header
LB: loop body
LE: loop exit
PB: predicated region body
PF: predicated region fallthrough
CT: control target
= control target key end

     0   :  { %s1492_s0 = inlined_call_operand.hbm [shape: f32[64,128], index: 0, kind: input, shape index: {}]   ;;  %s1493_s1 = inlined_call_operand.hbm [shape: f32[64,16,128], index: 1, kind: input, shape index: {}]   ;;  %s1494_s2 = inlined_call_operand.hbm [shape: f32[16,128], index: 2, kind: output, shape index: {}]  }
   0x1   :  { %1499 = sst [smem:[#allocation14_spill]] %s1492_s0 }
   0x2   :  { %7 = vsyncpa [#allocation4], 0 }
   0x3   :  { %9 = vsyncpa [#allocation4 + $0x1], 0 }
   0x4   :  { %10 = vsyncpa [#allocation7], 0 }
   0x5   :  { %12 = vsyncpa [#allocation7 + $0x1], 0 }
   0x6   :  { %13 = vsyncpa [#allocation5], 0 }
   0x7   :  { %15 = vsyncpa [#allocation5 + $0x1], 0  ;;  %s1133_s9 = smov 0   ;;  %s1135_s10 = smov 0  }
   0x8   :  { %s1137_s11 = smov 0   ;;  %s1139_s12 = smov 0  }
   0x9   :  { %s1141_s13 = smov 0   ;;  %s1143_s14 = smov 0  }
   0xa   :  { %s1145_s15 = smov 0   ;;  %s1147_s16 = smov 0  }
   0xb   :  { %s1149_s17 = smov 0   ;;  %s1151_s18 = smov 0  }
   0xc   :  { %s1153_s19 = smov 0  }
   0xd LB: > { %s773_s20 = sadd.s32 4294967295, %s1108_s19   ;;  %s774_s21 = sadd.s32 4294967294, %s1108_s19   ;;  %s1108_s19 = sphi %s1153_s19, %s21_s19   ;;  %s1104_s18 = sphi %s1151_s18, %s1525_s18   ;;  %s1100_s17 = sphi %s1149_s17, %s1524_s17   ;;  %s1096_s16 = sphi %s1147_s16, %s1523_s16   ;;  %s1092_s15 = sphi %s1145_s15, %s1522_s15   ;;  %s1088_s14 = sphi %s1143_s14, %s1521_s14   ;;  %s1084_s13 = sphi %s1141_s13, %s1520_s13   ;;  %s1080_s12 = sphi %s1139_s12, %s1519_s12   ;;  %s1076_s11 = sphi %s1137_s11, %s1518_s11   ;;  %s1072_s10 = sphi %s1135_s10, %s1517_s10   ;;  %s1068_s9 = sphi %s1133_s9, %s1516_s9  }
   0xe   : > { %s30_s22 = sadd.s32 1, %s1100_s17  ;;  %s33_s23 = sadd.s32 1, %s1104_s18 }
   0xf   : > { %p31_p0 = scmp.ge.s32.totalorder %s30_s22, 4  ;;  %s775_s24 = sshll.u32 %s1104_s18, 2 }
  0x10   : > { %s1192_s25 = sadd.s32 %s1100_s17, %s775_s24  ;;  %s44_s26 = sadd.s32 1, %s1088_s14 }
  0x11   : > { %s1527_s22 = smov (%p31_p0, %s30_s22), 0  ;;  %s1529_s23 = smov (!%p31_p0, %s33_s23), %s1104_s18 }
  0x12   : > { %1500 = sst [smem:[#allocation12_spill]] %s1527_s22  ;;  %p51_p1 = scmp.ne.s32.totalorder %s1088_s14, %s1084_s13 }
  0x13   : > { %p52_p2 = scmp.eq.s32.totalorder %s1108_s19, 0  ;;  %p35_p3 = scmp.ge.s32.totalorder %s1529_s23, 2 }
  0x14   : > { %p57_p4 = scmp.ne.s32.totalorder %s1084_s13, %s1080_s12  ;;  %p58_p6 = scmp.eq.s32.totalorder %s773_s20, 0 }
  0x15   : > { %p1202_p5 = por %p52_p2, %p51_p1  ;;  %s1531_s23 = smov (%p35_p3, %s1529_s23), 0 }
  0x16   : > { %1502 = sst [smem:[#allocation13_spill]] %s1531_s23  ;;  %p1208_p7 = por %p58_p6, %p57_p4 }
  0x17   : > { %s100_s29 = sadd.s32 1, %s1076_s11  ;;  %s776_s30 = sshll.u32 %s1531_s23, 2 }
  0x18   : > { %s1503_s28 = scalar_select %p1208_p7, 1, 0 }
  0x19   : > { %s97_s3 = ssub.s32 %s1104_s18, %s1531_s23  ;;  %s40_s4 = sadd.s32 %s776_s30, %s1527_s22 }
  0x1a   : > { %p98_p8 = scmp.eq.s32.totalorder %s97_s3, 0  ;;  %s41_s5 = ssub.s32 %s1192_s25, %s40_s4 }
  0x1b   : > { %p110_p9 = scmp.ne.s32.totalorder %s1076_s11, %s1072_s10  ;;  %p42_p10 = scmp.eq.s32.totalorder %s41_s5, 0 }
  0x1c   : > { %p111_p11 = scmp.eq.s32.totalorder %s773_s20, 7  ;;  %p116_p13 = scmp.ne.s32.totalorder %s1072_s10, %s1068_s9 }
  0x1d   : > { %s1221_s6 = scalar_select %p98_p8, %s1076_s11, %s100_s29  }
  0x1e   : > { %s1224_s7 = scalar_select %p42_p10, %s1088_s14, %s44_s26  }
  0x1f   : > { %p1226_p12 = por %p111_p11, %p110_p9  ;;  %p117_p0 = scmp.eq.s32.totalorder %s774_s21, 7 }
  0x20   : > { %p821_p1 = scmp.lt.s32.totalorder %s1108_s19, 8  ;;  %s1236_s12 = sand.u32 1, %s1088_s14  }
  0x21   : > { %s1504_s8 = scalar_select %p1226_p12, 1, 0 }
  0x22   : > { %p1238_p2 = por %p117_p0, %p116_p13  ;;  %s781_s24 = sshll.u32 %s1236_s12, 3 }
  0x23   : > { %s783_s29 = sshll.u32 %s1192_s25, 7  ;;  %s1506_s0 = sld [smem:[#allocation14_spill]] }
  0x24   : > { %s1505_s20 = scalar_select %p1238_p2, 1, 0 }
  0x25   : > { %s141_s21 = scalar_lea.vmem [#allocation3], %s781_s24  ;;  %p1251_p3 = pnand %p821_p1, %p1202_p5 }
  0x26   : > { %s150_s4 = sshll.u32 %s141_s21, 4  ;;  %s138_s26 = scalar_lea.sflag [#allocation4], %s1236_s12  ;;  %s1255_s4 = int_to_ptr.vmem [resolvable:$true] %s150_s4 }
  0x27   : > { %p924_p8 = pneg %p1251_p3 }
  0x29   : > { %s1247_s3 = scalar_lea.hbm %s1506_s0, %s783_s29  ;;  %s927_s30 = scalar_lea.hbm %s1506_s0, 1024 }
  0x2a   : > { %s922_s29 = scalar_lea.hbm %s1247_s3, 128  ;;  %p928_p5 = scmp.lt.u32.totalorder %s1247_s3, %s1506_s0 }
  0x2b   : > { %p923_p6 = scmp.ne.s32.totalorder %s1247_s3, %s922_s29  ;;  %p929_p11 = scmp.lt.u32.totalorder %s927_s30, %s922_s29 }
  0x2c   : > { %p931_p0 = scmp.lt.u32.totalorder %s922_s29, %s1247_s3 }
  0x2d   : > { %p925_p9 = pnand %p924_p8, %p923_p6  ;;  %p930_p13 = por %p929_p11, %p928_p5 }
  0x2f   : > { %p926_p10 = pneg %p925_p9  ;;  %p932_p1 = por %p931_p0, %p930_p13 }
  0x31   : > { %p933_p4 = pnand %p932_p1, %p926_p10 }
  0x33   : > { %936 = shalt.err (!%p933_p4)
}
  0x34   : > { %s937_s23 = scalar_lea.vmem %s1255_s4, 128  ;;  %s1110_s27 = smov [#allocation3]  }
  0x35   : > { %p938_p6 = scmp.ne.s32.totalorder %s1255_s4, %s937_s23  ;;  %s942_s24 = sshll.u32 %s1110_s27, 4  ;;  %s943_s24 = int_to_ptr.vmem [resolvable:$false] %s942_s24 }
  0x36   : > { %s944_s22 = scalar_lea.vmem %s943_s24, 256  ;;  %p945_p12 = scmp.lt.s32.totalorder %s1255_s4, %s943_s24 }
  0x37   : > { %p940_p9 = pnand %p938_p6, %p924_p8  ;;  %p946_p5 = scmp.lt.s32.totalorder %s944_s22, %s937_s23 }
  0x39   : > { %p941_p2 = pneg %p940_p9  ;;  %p947_p11 = por %p946_p5, %p945_p12 }
  0x3b   : > { %p948_p13 = pnand %p947_p11, %p941_p2 }
  0x3d   : > { %951 = shalt.err (!%p948_p13)
}
  0x3e   : > { %813 = dma.hbm_to_vmem [thread:$0]  (!%p1251_p3), %s1247_s3, 128, %s1255_s4, %s138_s26  }
  0x3f   : > { %p179_p4 = scmp.lt.s32.totalorder %s1108_s19, 9  ;;  %s784_s29 = sshll.u32 %s1236_s12, 7 }
  0x40   : > { %s1508_s30 = sshll.u32 %s1192_s25, 11  ;;  %p1509_p12 = scmp.ge.s32.totalorder %s1108_s19, 1 }
  0x41   : > { %s1292_s23 = scalar_lea.hbm %s1493_s1, %s1508_s30  ;;  %s161_s22 = scalar_lea.vmem [#allocation6], %s784_s29 }
  0x42   : > { %p1296_p2 = pnand %p1509_p12, %p179_p4  ;;  %s171_s0 = sshll.u32 %s161_s22, 4  ;;  %s1300_s0 = int_to_ptr.vmem [resolvable:$true] %s171_s0 }
  0x43   : > { %s158_s3 = scalar_lea.sflag [#allocation7], %s1236_s12  ;;  %s952_s25 = scalar_lea.hbm %s1292_s23, 2048 }
  0x44   : > { %p953_p10 = scmp.ne.s32.totalorder %s1292_s23, %s952_s25  ;;  %s957_s30 = scalar_lea.hbm %s1493_s1, 16384 }
  0x45   : > { %p958_p6 = scmp.lt.u32.totalorder %s1292_s23, %s1493_s1  ;;  %p959_p9 = scmp.lt.u32.totalorder %s957_s30, %s952_s25 }
  0x46   : > { %p955_p0 = pnand %p953_p10, %p924_p8  ;;  %p961_p11 = scmp.lt.u32.totalorder %s952_s25, %s1292_s23 }
  0x47   : > { %p960_p5 = por %p959_p9, %p958_p6 }
  0x48   : > { %p956_p1 = pneg %p955_p0 }
  0x49   : > { %p962_p13 = por %p961_p11, %p960_p5 }
  0x4b   : > { %p963_p4 = pnand %p962_p13, %p956_p1 }
  0x4d   : > { %966 = shalt.err (!%p963_p4)
}
  0x4e   : > { %s967_s29 = scalar_lea.vmem %s1300_s0, 2048  ;;  %s1111_s22 = smov [#allocation6]  }
  0x4f   : > { %p968_p12 = scmp.ne.s32.totalorder %s1300_s0, %s967_s29  ;;  %s972_s4 = sshll.u32 %s1111_s22, 4  ;;  %s973_s4 = int_to_ptr.vmem [resolvable:$false] %s972_s4 }
  0x50   : > { %s974_s26 = scalar_lea.vmem %s973_s4, 4096  ;;  %p975_p7 = scmp.lt.s32.totalorder %s1300_s0, %s973_s4 }
  0x51   : > { %p970_p10 = pnand %p968_p12, %p924_p8  ;;  %p976_p6 = scmp.lt.s32.totalorder %s974_s26, %s967_s29 }
  0x53   : > { %p971_p0 = pneg %p970_p10  ;;  %p977_p9 = por %p976_p6, %p975_p7 }
  0x55   : > { %p978_p5 = pnand %p977_p9, %p971_p0 }
  0x57   : > { %981 = shalt.err (!%p978_p5)
}
  0x58   : > { %s1112_s25 = smov 128   ;;  %s1113_s30 = smov 8  }
  0x59   : > { %816 = dma.hbm_to_vmem [thread:$0]  (!%p1251_p3), %s1292_s23, 2048, %s1300_s0, %s158_s3, %s1112_s25, %s1112_s25, %s1113_s30  }
  0x5a   : > { %183 = sbr.rel (%p1296_p2) target bundleno = 707 (0x2c3), region = 28  ;;  %s185_s21 = sand.u32 (!%p1296_p2), 1, %s1084_s13  }
  0x5b   : > { %s790_s27 = sshll.u32 (!%p1296_p2), %s185_s21, 3  ;;  %s186_s29 = scalar_lea.sflag (!%p1296_p2), [#allocation4], %s185_s21 }
  0x5c   : > { %s189_s22 = scalar_lea.vmem (!%p1296_p2), [#allocation3], %s790_s27  ;;  %p1511_p7 = scmp.ne.s32.totalorder (!%p1296_p2), %s1503_s28, 0 }
  0x61   : > { %1055 = dma.done.wait (%p1511_p7), %s186_s29, 128  }
  0x62   : > { %1057 = vsyncadd (%p1511_p7), %s186_s29, 4294967168  ;;  %s791_s4 = sshll.u32 %s185_s21, 7  ;;  %s195_s26 = scalar_lea.sflag [#allocation7], %s185_s21 }
  0x63   : > { %s1335_s5 = scalar_lea.vmem [#allocation6], %s791_s4 }
  0x64   : > { %1059 = dma.done.wait (%p1511_p7), %s195_s26, 2048  }
  0x65   : > { %1061 = vsyncadd (%p1511_p7), %s195_s26, 4294965248  ;;  %s221_s0 = sand.u32 1, %s1072_s10   ;;  %p793_p3 = scmp.ne.s32.totalorder %s1092_s15, 0 }
  0x66   : > { %s1344_s12 = sshll.u32 %s221_s0, 3  ;;  %vm233_vm0 = vcmask (!%p793_p3), 0   ;;  %v1114_v0 = vmov (!%p793_p3), 0.0  }
  0x67   : > { %s223_s23 = scalar_lea.vmem [#allocation8], %s1344_s12  ;;  %232 = sbr.rel (%p793_p3) target bundleno = 110 (0x6e), region = 40  ;;  %234 = vst.msk [vmem:[#allocation2] sm:$0x1] (!%p793_p3), %vm233_vm0, %v1114_v0 }
  0x6e PF: > { %v235_v1 = vld [vmem:[%s189_s22] sm:$0xff]  ;;  %v257_v2 = vlaneseq  ;;  %v1115_v3 = vmov 1966171168   ;;  %v236_v17 = vld [vmem:[%s1335_s5] sm:$0xff]  ;;  %v245_v18 = vld [vmem:[%s1335_s5 + $0x48] sm:$0xff]  ;;  %vm434_vm1 = vcmask 130112  }
  0x6f   : > { %v255_v4 = vunpack.c.l.s4 %v1115_v3  ;;  %v253_v8 = vcombine.high %v235_v1, %v235_v1  ;;  %v237_v22 = vld [vmem:[%s1335_s5 + $0x8] sm:$0xff]  ;;  %v238_v23 = vld [vmem:[%s1335_s5 + $0x10] sm:$0xff]  ;;  %v244_v29 = vld [vmem:[%s1335_s5 + $0x40] sm:$0xff]  ;;  %vm499_vm2 = vcmask 1041409   ;;  %vm501_vm3 = vcmask 1042434   ;;  %p794_p8 = scmp.ne.s32.totalorder %s1092_s15, 3 }
  0x70   : > { %v258_v5 = vshrl.u32 %v257_v2, 7  ;;  %v1348_v6 = vand.u32 127, %v257_v2  ;;  %v239_v31 = vld [vmem:[%s1335_s5 + $0x18] sm:$0xff]  ;;  %v241_v37 = vld [vmem:[%s1335_s5 + $0x28] sm:$0xff]  ;;  %v240_v38 = vld [vmem:[%s1335_s5 + $0x20] sm:$0xff]  ;;  %vm503_vm4 = vcmask 1043459  }
  0x71   : > { %v256_v7 = vunpack.c.0.s8 %v255_v4  ;;  %v243_v43 = vld [vmem:[%s1335_s5 + $0x38] sm:$0xff]  ;;  %v242_v44 = vld [vmem:[%s1335_s5 + $0x30] sm:$0xff]  ;;  %v249_v57 = vld [vmem:[%s1335_s5 + $0x68] sm:$0xff]  ;;  %vm505_vm5 = vcmask 1044484   ;;  %vm507_vm6 = vcmask 1045509   ;;  %vm509_vm7 = vcmask 1046534  }
  0x72   : > { %v1351_v9 = vsub.s32 %v1348_v6, %v258_v5  ;;  %v304_v12 = vsub.s32 0, %v258_v5  ;;  %v429_v45 = vadd.s32 4294967288, %v1348_v6  ;;  %v247_v51 = vld [vmem:[%s1335_s5 + $0x58] sm:$0xff]  ;;  %v246_v52 = vld [vmem:[%s1335_s5 + $0x50] sm:$0xff]  ;;  %v248_v58 = vld [vmem:[%s1335_s5 + $0x60] sm:$0xff]  ;;  %vm511_vm8 = vcmask 1047559  }
  0x73   : > { %v259_v10 = vsub.s32 %v256_v7, %v258_v5  ;;  %v251_v62 = vld [vmem:[%s1335_s5 + $0x78] sm:$0xff]  ;;  %v250_v63 = vld [vmem:[%s1335_s5 + $0x70] sm:$0xff]  ;;  %vm392_vm9 = vcmp.lt.s32.totalorder %v1348_v6, 4  ;;  %vm620_vm10 = vcmask 130048   ;;  %vm634_vm11 = vcmask 0  }
  0x74   : > { %v1364_v50 = vsub.s32 %v429_v45, %v258_v5 }
  0x75   : > { %v260_v11 = vrot.slane %v235_v1, %v259_v10  ;;  %v267_v13 = vrot.slane %v253_v8, %v259_v10 }
  0x77   : > { %v276_v14 = vrot.slane %v260_v11, %v259_v10  ;;  %v283_v15 = vrot.slane %v267_v13, %v259_v10  ;;  %v268_v16 = vcombine.high %v260_v11, %v260_v11  ;;  %v269_v33 = vcombine.high %v267_v13, %v267_v13 }
  0x79   : > { %v305_v19 = vrot.slane %v276_v14, %v304_v12  ;;  %v321_v20 = vrot.slane %v283_v15, %v304_v12  ;;  %v290_v21 = vrot.slane %v268_v16, %v259_v10  ;;  %v298_v30 = vcombine.high %v276_v14, %v276_v14 }
  0x7a   : > { %v297_v39 = vrot.slane %v269_v33, %v259_v10  ;;  %v299_v47 = vcombine.high %v283_v15, %v283_v15 }
  0x7b   : > { %v342_v24 = vmul.f32 %v305_v19, %v236_v17  ;;  %v351_v25 = vmul.f32 %v321_v20, %v245_v18  ;;  %v309_v26 = vrot.slane %v290_v21, %v304_v12  ;;  %v343_v27 = vmul.f32 %v305_v19, %v237_v22 }
  0x7c   : > { %v350_v32 = vmul.f32 %v321_v20, %v244_v29  ;;  %v313_v35 = vrot.slane %v298_v30, %v304_v12  ;;  %v300_v36 = vcombine.high %v290_v21, %v290_v21  ;;  %v325_v46 = vrot.slane %v297_v39, %v304_v12 }
  0x7d   : > { %358 = vadd.xlane.f32.xlu0 %v342_v24  ;;  %376 = vadd.xlane.f32.xlu1 %v351_v25  ;;  %v344_v28 = vmul.f32 %v309_v26, %v238_v23  ;;  %v345_v34 = vmul.f32 %v309_v26, %v239_v31  ;;  %v329_v53 = vrot.slane %v299_v47, %v304_v12 }
  0x7e   : > { %v347_v40 = vmul.f32 %v313_v35, %v241_v37  ;;  %v346_v41 = vmul.f32 %v313_v35, %v240_v38  ;;  %v317_v42 = vrot.slane %v300_v36, %v304_v12  ;;  %v353_v54 = vmul.f32 %v325_v46, %v247_v51 }
  0x7f   : > { %v352_v55 = vmul.f32 %v325_v46, %v246_v52  ;;  %v301_v56 = vcombine.high %v297_v39, %v297_v39  ;;  %v355_v59 = vmul.f32 %v329_v53, %v249_v57  ;;  %v354_v60 = vmul.f32 %v329_v53, %v248_v58 }
  0x80   : > { %v349_v48 = vmul.f32 %v317_v42, %v243_v43  ;;  %v348_v49 = vmul.f32 %v317_v42, %v242_v44 }
  0x81   : > { %360 = vadd.xlane.f32.xlu0 %v343_v27  ;;  %362 = vadd.xlane.f32.xlu1 %v344_v28  ;;  %v333_v61 = vrot.slane %v301_v56, %v304_v12 }
  0x83   : > { %v357_v0 = vmul.f32 %v333_v61, %v251_v62  ;;  %v356_v1 = vmul.f32 %v333_v61, %v250_v63 }
  0x85   : > { %364 = vadd.xlane.f32.xlu1 %v345_v34  ;;  %374 = vadd.xlane.f32.xlu0 %v350_v32 }
  0x89   : > { %368 = vadd.xlane.f32.xlu1 %v347_v40  ;;  %366 = vadd.xlane.f32.xlu0 %v346_v41 }
  0x8d   : > { %372 = vadd.xlane.f32.xlu1 %v349_v48  ;;  %370 = vadd.xlane.f32.xlu0 %v348_v49 }
  0x91   : > { %380 = vadd.xlane.f32.xlu1 %v353_v54  ;;  %378 = vadd.xlane.f32.xlu0 %v352_v55 }
  0x95   : > { %384 = vadd.xlane.f32.xlu1 %v355_v59  ;;  %382 = vadd.xlane.f32.xlu0 %v354_v60 }
  0x99   : > { %388 = vadd.xlane.f32.xlu1 %v357_v0  ;;  %386 = vadd.xlane.f32.xlu0 %v356_v1 }
 0x10a   : > { %v359_v2 = vpop.xlane.xlu0 %358  ;;  %v377_v3 = vpop.xlane.xlu1 %376 }
 0x10b   : > { %v393_v4 = vsub.f32 0.0, %v359_v2  ;;  %v428_v8 = vrot.slane %v359_v2, %v1351_v9  ;;  %v402_v12 = vsub.f32 0.0, %v377_v3  ;;  %v470_v24 = vrot.slane %v377_v3, %v1364_v50 }
 0x10d   : > { %v533_v13 = vrot.slane %v393_v4, %v1351_v9  ;;  %v573_v25 = vrot.slane %v402_v12, %v1364_v50 }
 0x10e   : > { %v361_v5 = vpop.xlane.xlu0 %360  ;;  %v363_v7 = vpop.xlane.xlu1 %362 }
 0x10f   : > { %v394_v10 = vsub.f32 0.0, %v361_v5  ;;  %v433_v11 = vrot.slane %v361_v5, %v1364_v50  ;;  %v395_v16 = vsub.f32 0.0, %v363_v7  ;;  %v439_v17 = vrot.slane %v363_v7, %v1351_v9 }
 0x111   : > { %v435_v14 = vsel %vm434_vm1, %v433_v11, %v428_v8  ;;  %v537_v15 = vrot.slane %v394_v10, %v1364_v50  ;;  %v542_v27 = vrot.slane %v395_v16, %v1351_v9 }
 0x112   : > { %v365_v18 = vpop.xlane.xlu1 %364  ;;  %v375_v19 = vpop.xlane.xlu0 %374 }
 0x113   : > { %v538_v20 = vsel %vm434_vm1, %v537_v15, %v533_v13  ;;  %v396_v21 = vsub.f32 0.0, %v365_v18  ;;  %v443_v22 = vrot.slane %v365_v18, %v1364_v50  ;;  %v401_v23 = vsub.f32 0.0, %v375_v19 }
 0x114   : > { %v466_v26 = vrot.slane %v375_v19, %v1351_v9 }
 0x115   : > { %v444_v28 = vsel %vm434_vm1, %v443_v22, %v439_v17  ;;  %v546_v29 = vrot.slane %v396_v21, %v1364_v50  ;;  %v569_v30 = vrot.slane %v401_v23, %v1351_v9 }
 0x116   : > { %v500_v31 = vsel %vm499_vm2, %v444_v28, %v435_v14  ;;  %v471_v32 = vsel %vm434_vm1, %v470_v24, %v466_v26  ;;  %v369_v33 = vpop.xlane.xlu1 %368  ;;  %v367_v34 = vpop.xlane.xlu0 %366 }
 0x117   : > { %v547_v35 = vsel %vm434_vm1, %v546_v29, %v542_v27  ;;  %v574_v36 = vsel %vm434_vm1, %v573_v25, %v569_v30  ;;  %v398_v37 = vsub.f32 0.0, %v369_v33  ;;  %v452_v38 = vrot.slane %v369_v33, %v1364_v50 }
 0x118   : > { %v602_v39 = vsel %vm499_vm2, %v547_v35, %v538_v20  ;;  %v397_v40 = vsub.f32 0.0, %v367_v34  ;;  %v448_v41 = vrot.slane %v367_v34, %v1351_v9 }
 0x119   : > { %v555_v42 = vrot.slane %v398_v37, %v1364_v50 }
 0x11a   : > { %v453_v43 = vsel %vm434_vm1, %v452_v38, %v448_v41  ;;  %v551_v44 = vrot.slane %v397_v40, %v1351_v9  ;;  %v373_v45 = vpop.xlane.xlu1 %372  ;;  %v371_v46 = vpop.xlane.xlu0 %370 }
 0x11b   : > { %v502_v47 = vsel %vm501_vm3, %v453_v43, %v500_v31  ;;  %v400_v48 = vsub.f32 0.0, %v373_v45  ;;  %v461_v49 = vrot.slane %v373_v45, %v1364_v50  ;;  %v399_v51 = vsub.f32 0.0, %v371_v46 }
 0x11c   : > { %v556_v52 = vsel %vm434_vm1, %v555_v42, %v551_v44  ;;  %v457_v53 = vrot.slane %v371_v46, %v1351_v9 }
 0x11d   : > { %v603_v54 = vsel %vm501_vm3, %v556_v52, %v602_v39  ;;  %v564_v55 = vrot.slane %v400_v48, %v1364_v50  ;;  %v560_v56 = vrot.slane %v399_v51, %v1351_v9 }
 0x11e   : > { %v462_v57 = vsel %vm434_vm1, %v461_v49, %v457_v53  ;;  %v381_v58 = vpop.xlane.xlu1 %380  ;;  %v379_v59 = vpop.xlane.xlu0 %378  ;;  %v631_v53 = vld [vmem:[#allocation2] sm:$0x1] }
 0x11f   : > { %v504_v60 = vsel %vm503_vm4, %v462_v57, %v502_v47  ;;  %v565_v61 = vsel %vm434_vm1, %v564_v55, %v560_v56  ;;  %v404_v62 = vsub.f32 0.0, %v381_v58  ;;  %v479_v63 = vrot.slane %v381_v58, %v1364_v50 }
 0x120   : > { %v604_v0 = vsel %vm503_vm4, %v565_v61, %v603_v54  ;;  %v506_v1 = vsel %vm505_vm5, %v471_v32, %v504_v60  ;;  %v403_v2 = vsub.f32 0.0, %v379_v59  ;;  %v475_v3 = vrot.slane %v379_v59, %v1351_v9 }
 0x121   : > { %v582_v4 = vrot.slane %v404_v62, %v1364_v50  ;;  %v605_v5 = vsel %vm505_vm5, %v574_v36, %v604_v0  ;;  %v1116_v57 = vmov (!%p794_p8), 0  }
 0x122   : > { %v480_v7 = vsel %vm434_vm1, %v479_v63, %v475_v3  ;;  %v578_v8 = vrot.slane %v403_v2, %v1351_v9  ;;  %v385_v10 = vpop.xlane.xlu1 %384  ;;  %v383_v11 = vpop.xlane.xlu0 %382  ;;  %921 = vset.pattern.permute.xlu0 (!%p794_p8), %v1116_v57 }
 0x123   : > { %v508_v12 = vsel %vm507_vm6, %v480_v7, %v506_v1  ;;  %v406_v13 = vsub.f32 0.0, %v385_v10  ;;  %v488_v14 = vrot.slane %v385_v10, %v1364_v50  ;;  %v405_v15 = vsub.f32 0.0, %v383_v11 }
 0x124   : > { %v583_v16 = vsel %vm434_vm1, %v582_v4, %v578_v8  ;;  %v484_v17 = vrot.slane %v383_v11, %v1351_v9 }
 0x125   : > { %v606_v18 = vsel %vm507_vm6, %v583_v16, %v605_v5  ;;  %v591_v19 = vrot.slane %v406_v13, %v1364_v50  ;;  %v587_v20 = vrot.slane %v405_v15, %v1351_v9 }
 0x126   : > { %v489_v21 = vsel %vm434_vm1, %v488_v14, %v484_v17  ;;  %v389_v22 = vpop.xlane.xlu1 %388  ;;  %v387_v23 = vpop.xlane.xlu0 %386 }
 0x127   : > { %v510_v24 = vsel %vm509_vm7, %v489_v21, %v508_v12  ;;  %v592_v25 = vsel %vm434_vm1, %v591_v19, %v587_v20  ;;  %v408_v26 = vsub.f32 0.0, %v389_v22  ;;  %v497_v27 = vrot.slane %v389_v22, %v1364_v50 }
 0x128   : > { %v407_v28 = vsub.f32 0.0, %v387_v23  ;;  %v493_v29 = vrot.slane %v387_v23, %v1351_v9  ;;  %v607_v30 = vsel %vm509_vm7, %v592_v25, %v606_v18 }
 0x129   : > { %v600_v31 = vrot.slane %v408_v26, %v1364_v50 }
 0x12a   : > { %v498_v32 = vsel %vm434_vm1, %v497_v27, %v493_v29  ;;  %v596_v33 = vrot.slane %v407_v28, %v1351_v9 }
 0x12b   : > { %v512_v34 = vsel %vm511_vm8, %v498_v32, %v510_v24 }
 0x12c   : > { %v601_v35 = vsel %vm434_vm1, %v600_v31, %v596_v33 }
 0x12d   : > { %v608_v36 = vsel %vm511_vm8, %v601_v35, %v607_v30 }
 0x12e   : > { %v610_v37 = vsel %vm392_vm9, %v512_v34, %v608_v36 }
 0x12f   : > { %v612_v38 = vand.u32 2147483647, %v610_v37  ;;  %v611_v50 = vmin.f32 %v610_v37, 0.0 }
 0x131   : > { %v613_v39 = vsub.f32 0.0, %v612_v38 }
 0x133   : > { %v614_v40 = vmul.f32 1.442695, %v613_v39 }
 0x135   : > { %917 = vpow2.f32 %v614_v40 }
 0x13f   : > { %v918_v41 = vpop.eup %917 }
 0x140   : > { %v616_v42 = vadd.f32 1.0, %v918_v41 }
 0x142   : > { %919 = vlog2.f32 %v616_v42 }
 0x14c   : > { %v920_v43 = vpop.eup %919 }
 0x14d   : > { %v618_v44 = vmul.f32 0.6931472, %v920_v43 }
 0x14f   : > { %v619_v45 = vsub.f32 %v611_v50, %v618_v44 }
 0x151   : > { %v621_v9 = vsel %vm620_vm10, %v619_v45, 0.0 }
 0x152   : > { %622 = vadd.xlane.f32.xlu0 %v621_v9 }
 0x1df   : > { %v623_v6 = vpop.xlane.xlu0 %622 }
 0x1e0   : > { %v624_v46 = vrot.slane %v623_v6, 4 }
 0x1e2   : > { %v625_v47 = vadd.f32 %v624_v46, %v623_v6 }
 0x1e4   : > { %v626_v48 = vrot.slane %v625_v47, 2 }
 0x1e6   : > { %v627_v49 = vadd.f32 %v626_v48, %v625_v47 }
 0x1e8   : > { %v628_v51 = vrot.slane %v627_v49, 1 }
 0x1ea   : > { %v629_v52 = vadd.f32 %v628_v51, %v627_v49 }
 0x1ec   : > { %802 = vpush %v629_v52 }
 0x21b   : > { %639 = sbr.rel (%p794_p8) target bundleno = 682 (0x2aa), region = 44 }
 0x21d   : > { %s803_s28 = spop %802 }
 0x21e   : > { %v632_v54 = vstv %s803_s28 }
 0x21f   : > { %v633_v55 = vadd.f32 %v632_v54, %v631_v53 }
 0x221   : > { %635 = vst.msk [vmem:[#allocation2] sm:$0x1] %vm634_vm11, %v633_v55 }
 0x228   : > { %v795_v56 = vld [vmem:[#allocation2] ss:$0 sm:$0xff] }
 0x229   : > { %647 = vperm.xlu0 %921, %v795_v56  }
 0x2a8   : > { %v648_v58 = vpop.permute.xlu0 %647 }
 0x2a9   : > { %650 = vst [vmem:[%s223_s23] sm:$0xff] %v648_v58 }
 0x2aa PF: > { %s797_s24 = sshll.u32 %s1096_s16, 7  ;;  %s665_s15 = sshll.u32 %s223_s23, 4  ;;  %s666_s15 = int_to_ptr.vmem [resolvable:$true] %s665_s15 }
 0x2ab   : > { %s1432_s30 = scalar_lea.hbm %s1494_s2, %s797_s24  ;;  %s652_s21 = scalar_lea.sflag [#allocation5], %s221_s0 }
 0x2ac   : > { %s982_s27 = scalar_lea.vmem %s666_s15, 128  ;;  %p1512_p1 = scmp.ne.s32.totalorder %s1504_s8, 0 }
 0x2ad   : > { %p983_p2 = scmp.ne.s32.totalorder %s666_s15, %s982_s27  ;;  %s1117_s29 = smov [#allocation8]  }
 0x2ae   : > { %s986_s22 = sshll.u32 %s1117_s29, 4  ;;  %s987_s22 = int_to_ptr.vmem [resolvable:$false] %s986_s22 }
 0x2af   : > { %p984_p11 = pnand %p983_p2, %p1512_p1  ;;  %s988_s4 = scalar_lea.vmem %s987_s22, 256 }
 0x2b0   : > { %p989_p4 = scmp.lt.s32.totalorder %s666_s15, %s987_s22  ;;  %p990_p12 = scmp.lt.s32.totalorder %s988_s4, %s982_s27 }
 0x2b1   : > { %p985_p13 = pneg %p984_p11 }
 0x2b2   : > { %p991_p10 = por %p990_p12, %p989_p4 }
 0x2b4   : > { %p992_p0 = pnand %p991_p10, %p985_p13 }
 0x2b6   : > { %995 = shalt.err (!%p992_p0)
}
 0x2b7   : > { %s996_s16 = scalar_lea.hbm %s1432_s30, 128  ;;  %s1000_s0 = scalar_lea.hbm %s1494_s2, 256 }
 0x2b8   : > { %p997_p6 = scmp.ne.s32.totalorder %s1432_s30, %s996_s16  ;;  %p1001_p7 = scmp.lt.u32.totalorder %s1432_s30, %s1494_s2 }
 0x2b9   : > { %p1002_p3 = scmp.lt.u32.totalorder %s1000_s0, %s996_s16  ;;  %p1004_p2 = scmp.lt.u32.totalorder %s996_s16, %s1432_s30 }
 0x2ba   : > { %p998_p9 = pnand %p997_p6, %p1512_p1 }
 0x2bb   : > { %p1003_p8 = por %p1002_p3, %p1001_p7 }
 0x2bc   : > { %p999_p5 = pneg %p998_p9 }
 0x2bd   : > { %p1005_p11 = por %p1004_p2, %p1003_p8 }
 0x2bf   : > { %p1006_p13 = pnand %p1005_p11, %p999_p5 }
 0x2c1   : > { %1009 = shalt.err (!%p1006_p13)
}
 0x2c2   : > { %808 = dma.vmem_to_hbm [thread:$0]  (%p1512_p1), %s666_s15, 128, %s1432_s30, %s652_s21  }
 0x2c3 PF: > { %p822_p4 = scmp.ge.s32.totalorder %s1108_s19, 2  ;;  %s677_s28 = sand.u32 1, %s1068_s9  }
 0x2c4   : > { %p1513_p12 = scmp.ne.s32.totalorder %s1505_s20, 0  ;;  %s678_s24 = scalar_lea.sflag [#allocation5], %s677_s28 }
 0x2c6   : > { %p818_p10 = pnand %p822_p4, %p1513_p12 }
 0x2c8   : > { %1063 = dma.done.wait (!%p818_p10), %s678_s24, 128  }
 0x2c9   : > { %1065 = vsyncadd (!%p818_p10), %s678_s24, 4294967168  ;;  %s21_s19 = sadd.s32 1, %s1108_s19   ;;  %s1514_s8 = sld [smem:[#allocation12_spill]] }
 0x2ca   : > { %p18_p0 = scmp.ge.s32.totalorder %s21_s19, 10   ;;  %s1515_s3 = sld [smem:[#allocation13_spill]] }
 0x2cb   : > { %s1516_s9 = smov %s1072_s10  ;;  %s1517_s10 = smov %s1076_s11 }
 0x2cc   : > { %s1518_s11 = smov %s1221_s6  ;;  %s1519_s12 = smov %s1084_s13 }
 0x2cd   : > { %s1520_s13 = smov %s1088_s14  ;;  %s1521_s14 = smov %s1224_s7 }
 0x2ce   : > { %s1522_s15 = smov %s1100_s17  ;;  %s1523_s16 = smov %s1104_s18 }
 0x2cf   : > { %s1524_s17 = smov %s1514_s8  ;;  %20 = sbr.rel (!%p18_p0) target bundleno = 13 (0xd), region = 94 }
 0x2d0   : > { %s1525_s18 = smov %s1515_s3 }
 0x2d6   :  { %683 = vsyncpa [#allocation4], 1 }
 0x2d7   :  { %685 = vsyncpa [#allocation4 + $0x1], 1 }
 0x2d8   :  { %686 = vsyncpa [#allocation7], 1 }
 0x2d9   :  { %688 = vsyncpa [#allocation7 + $0x1], 1 }
 0x2da   :  { %689 = vsyncpa [#allocation5], 1 }
 0x2db   :  { %691 = vsyncpa [#allocation5 + $0x1], 1 }

</bundles_post_ra>
